<compile_context>
chip_gen: v7x
topology: tpu7x:2x2x1
jax: 0.10.0
libtpu: 0.0.40
codegen_flags: <defaults>
</compile_context>

<pallas_src>
import math

import numpy as np

import jax
import jax.numpy as jnp
from jax import lax
from jax.experimental import pallas as pl
from jax.experimental.pallas import tpu as pltpu

# ---- module hyper-params (stand-ins for the free vars lab / inputs / medi) ----
LEN_LAB = 12
LEN_INPUTS = 10
LEN_MEDI = 10
DIM_EMBD = LEN_LAB + LEN_INPUTS + LEN_MEDI  # 32


def _round_up(x, m):
    return (x + m - 1) // m * m


def _self_attn_kernel(len_ref,                         # (B, 1) int32
                      he_ref, hl_ref, hi_ref, hm_ref,  # (B,Se,D) (B,Ll,D) (B,Li,D) (B,Lm,D)
                      w_ref,                           # (D, 3D) = [Wv.T | Wk.T | Wq.T/sqrt(D)]
                      bias_ref,                        # (B*Se_p, B*Kp) additive score mask
                      heo_ref, hlo_ref, hio_ref, hmo_ref,
                      x_ref):                          # VMEM scratch (B, R, D), 8-aligned blocks
    B, Se, D = he_ref.shape
    Ll = hl_ref.shape[1]
    Li = hi_ref.shape[1]
    Lm = hm_ref.shape[1]
    R = x_ref.shape[1]

    se_p = _round_up(Se, 8)
    ll_p = _round_up(Ll, 8)
    li_p = _round_up(Li, 8)
    lm_p = _round_up(Lm, 8)
    off_l = se_p                       # lab rows start (sublane-aligned)
    off_i = se_p + ll_p                # inputs rows start
    off_m = se_p + ll_p + li_p         # medi rows start
    kp = ll_p + li_p + lm_p            # padded key rows per batch

    he = he_ref[...].astype(jnp.float32)
    hl = hl_ref[...].astype(jnp.float32)
    hi = hi_ref[...].astype(jnp.float32)
    hm = hm_ref[...].astype(jnp.float32)

    # ---- stage all tokens into one aligned scratch; pads zeroed so padded V rows are finite ----
    x_ref[...] = jnp.zeros(x_ref.shape, x_ref.dtype)
    x_ref[:, 0:Se, :] = he
    x_ref[:, off_l:off_l + Ll, :] = hl
    x_ref[:, off_i:off_i + Li, :] = hi
    x_ref[:, off_m:off_m + Lm, :] = hm

    # ---- ONE fused projection matmul: (B*R, D) @ (D, 3D) ----
    x = x_ref[...].reshape(B * R, D)                       # R multiple of 8 -> clean merge
    qkv = jnp.dot(x, w_ref[...], preferred_element_type=jnp.float32)
    qkv = qkv.reshape(B, R, 3 * D)

    v_all = qkv[:, :, 0:D]             # V at lane offset 0 (consumed 3x)
    q = qkv[:, 0:se_p, 2 * D:3 * D]    # (B, se_p, D): Q for event rows (scale pre-folded)
    k = qkv[:, se_p:R, D:2 * D]        # (B, kp, D)
    v = v_all[:, se_p:R, :]            # (B, kp, D)

    mq = B * se_p
    nk = B * kp
    qf = q.reshape(mq, D)              # 16 / 48 rows per batch -> aligned reshapes
    kf = k.reshape(nk, D)
    vf = v.reshape(nk, D)

    # ---- ONE score matmul (block-diagonal mask as additive bias), ONE softmax, ONE PV matmul ----
    s = lax.dot_general(qf, kf, (((1,), (1,)), ((), ())),
                        preferred_element_type=jnp.float32)        # (mq, nk)
    s = s + bias_ref[...]                                          # 0 valid / -1e30 invalid

    m = jnp.max(s, axis=-1, keepdims=True)
    p = jnp.exp(s - m)                                             # invalid cols underflow to 0
    denom = jnp.sum(p, axis=-1, keepdims=True)
    z = jnp.dot(p, vf, preferred_element_type=jnp.float32)         # (mq, D)

    rcp = pl.reciprocal(denom, approx=True)                        # EUP vrcp slot
    rcp = rcp * (2.0 - denom * rcp)                                # one Newton step -> f32 accuracy
    z = z * rcp

    # ---- Z[b][length[b]:] = 0 : mask varies only over (B, Se); broadcast over D ----
    z3 = z.reshape(B, se_p, D)
    if se_p != Se:
        z3 = z3[:, 0:Se, :]
    lens = len_ref[...]                                            # (B, 1) int32
    row_ids = lax.broadcasted_iota(jnp.int32, (B, Se, 1), 1)
    z3 = jnp.where(row_ids < lens[:, :, None], z3, 0.0)

    # ---- residual adds; pass_v=True -> P = V (sliced at aligned sublane offsets) ----
    heo_ref[...] = (he + z3).astype(heo_ref.dtype)
    hlo_ref[...] = (hl + v_all[:, off_l:off_l + Ll, :]).astype(hlo_ref.dtype)
    hio_ref[...] = (hi + v_all[:, off_i:off_i + Li, :]).astype(hio_ref.dtype)
    hmo_ref[...] = (hm + v_all[:, off_m:off_m + Lm, :]).astype(hmo_ref.dtype)


def prepare_attention_weights(wq, wk, wv):
    """One-time weight prep (hoisted out of the per-call path).

    nn.Linear weights are (out, in); fuse [Wv.T | Wk.T | Wq.T / sqrt(D)] into one (D, 3D)
    RHS with V at lane 0 (it is consumed three times downstream)."""
    D = wq.shape[1]
    scale = 1.0 / math.sqrt(D)
    return jnp.concatenate([wv.T, wk.T, wq.T * scale], axis=1).astype(jnp.float32)


def _build_key_bias(B, Se, Ll, Li, Lm):
    """Static additive score mask (0 valid / -1e30 for cross-batch or pad key columns)."""
    se_p, ll_p, li_p, lm_p = (_round_up(v, 8) for v in (Se, Ll, Li, Lm))
    kp = ll_p + li_p + lm_p
    mq, nk = B * se_p, B * kp
    c = np.arange(nk)
    c_b, c_loc = c // kp, c % kp
    valid = ((c_loc < Ll)
             | ((c_loc >= ll_p) & (c_loc < ll_p + Li))
             | ((c_loc >= ll_p + li_p) & (c_loc < ll_p + li_p + Lm)))
    r_b = np.arange(mq)[:, None] // se_p
    mask = (r_b == c_b[None, :]) & valid[None, :]
    return np.where(mask, 0.0, -1e30).astype(np.float32)          # (mq, nk)


def self_attention_layer(h_e, h_l, h_i, h_m, length, w_fused):
    """Pallas implementation of SelfAttentionLayer.forward (qkv_diff=True, pass_v=True)."""
    B, Se, D = h_e.shape
    Ll, Li, Lm = h_l.shape[1], h_i.shape[1], h_m.shape[1]
    R = _round_up(Se, 8) + _round_up(Ll, 8) + _round_up(Li, 8) + _round_up(Lm, 8)

    lens2d = length.astype(jnp.int32).reshape(B, 1)
    key_bias = jnp.asarray(_build_key_bias(B, Se, Ll, Li, Lm))    # trace-time constant under jit

    vmem = pl.BlockSpec(memory_space=pltpu.MemorySpace.VMEM)

    he_o, hl_o, hi_o, hm_o = pl.pallas_call(
        _self_attn_kernel,
        out_shape=(
            jax.ShapeDtypeStruct(h_e.shape, h_e.dtype),
            jax.ShapeDtypeStruct(h_l.shape, h_l.dtype),
            jax.ShapeDtypeStruct(h_i.shape, h_i.dtype),
            jax.ShapeDtypeStruct(h_m.shape, h_m.dtype),
        ),
        in_specs=[vmem] * 7,
        out_specs=(vmem, vmem, vmem, vmem),
        scratch_shapes=[pltpu.VMEM((B, R, D), jnp.float32)],
        # Reuse the h_e / h_l / h_i / h_m HBM buffers for the outputs.
        input_output_aliases={1: 0, 2: 1, 3: 2, 4: 3},
    )(lens2d, h_e, h_l, h_i, h_m, w_fused, key_bias)

    return he_o, hl_o, hi_o, hm_o


def _reference(h_e, h_l, h_i, h_m, length, wq, wk, wv):
    """Pure-JAX reference matching the PyTorch forward (eval mode)."""
    h_c = jnp.concatenate([h_l, h_i, h_m], axis=1)
    Q = h_e @ wq.T
    K = h_c @ wk.T
    V = h_c @ wv.T
    scores = (Q @ jnp.swapaxes(K, -1, -2)) / math.sqrt(K.shape[-1])
    A = jax.nn.softmax(scores, axis=-1)
    Z = A @ V
    row = jnp.arange(h_e.shape[1])[None, :, None]
    Z = jnp.where(row < length[:, None, None], Z, 0.0)
    Ll, Li = h_l.shape[1], h_i.shape[1]
    return (h_e + Z,
            h_l + V[:, :Ll],
            h_i + V[:, Ll:Ll + Li],
            h_m + V[:, Ll + Li:])


def _kaiming_normal(key, out_dim, in_dim):
    # torch.nn.init.kaiming_normal_ default: fan_in mode, gain = sqrt(2)
    std = math.sqrt(2.0 / in_dim)
    return jax.random.normal(key, (out_dim, in_dim), dtype=jnp.float32) * std


if __name__ == "__main__":
    key = jax.random.PRNGKey(0)
    B, S_E, D = 2, 16, DIM_EMBD
    ks = jax.random.split(key, 7)

    h_e = jax.random.normal(ks[0], (B, S_E, D), dtype=jnp.float32)
    h_l = jax.random.normal(ks[1], (B, LEN_LAB, D), dtype=jnp.float32)
    h_i = jax.random.normal(ks[2], (B, LEN_INPUTS, D), dtype=jnp.float32)
    h_m = jax.random.normal(ks[3], (B, LEN_MEDI, D), dtype=jnp.float32)
    length = jnp.array([S_E, 10], dtype=jnp.int32)

    wq = _kaiming_normal(ks[4], D, D)
    wk = _kaiming_normal(ks[5], D, D)
    wv = _kaiming_normal(ks[6], D, D)

    # Weight preparation happens once, at "parameter load" time (not in the per-call path).
    w_fused = prepare_attention_weights(wq, wk, wv)

    refs = _reference(h_e, h_l, h_i, h_m, length, wq, wk, wv)

    fn = jax.jit(self_attention_layer)
    outs = jax.block_until_ready(fn(h_e, h_l, h_i, h_m, length, w_fused))

    for o, r in zip(outs, refs):
        assert o.shape == r.shape
        err = float(jnp.max(jnp.abs(o - r)))
        assert jnp.allclose(o, r, atol=5e-4, rtol=5e-4), err

    print("KERNEL_OK")
</pallas_src>

<mosaic_0001>
module attributes {stable_mosaic.version = 11 : i64} {
  func.func @_self_attn_kernel(%arg0: memref<2x1xi32, #tpu.memory_space<vmem>>, %arg1: memref<2x16x32xf32, #tpu.memory_space<vmem>>, %arg2: memref<2x12x32xf32, #tpu.memory_space<vmem>>, %arg3: memref<2x10x32xf32, #tpu.memory_space<vmem>>, %arg4: memref<2x10x32xf32, #tpu.memory_space<vmem>>, %arg5: memref<32x96xf32, #tpu.memory_space<vmem>>, %arg6: memref<32x96xf32, #tpu.memory_space<vmem>>, %arg7: memref<2x16x32xf32, #tpu.memory_space<vmem>>, %arg8: memref<2x12x32xf32, #tpu.memory_space<vmem>>, %arg9: memref<2x10x32xf32, #tpu.memory_space<vmem>>, %arg10: memref<2x10x32xf32, #tpu.memory_space<vmem>>, %arg11: memref<2x64x32xf32, #tpu.memory_space<vmem>>) attributes {dimension_semantics = [], scalar_prefetch = 0 : i64, scratch_operands = 1 : i64, tpu.core_type = #tpu.core_type<tc>} {
    %c0 = arith.constant 0 : index
    %c0_0 = arith.constant 0 : index
    %c0_1 = arith.constant 0 : index
    %0 = vector.load %arg1[%c0, %c0_0, %c0_1] : memref<2x16x32xf32, #tpu.memory_space<vmem>>, vector<2x16x32xf32>
    %c0_2 = arith.constant 0 : index
    %c0_3 = arith.constant 0 : index
    %c0_4 = arith.constant 0 : index
    %1 = vector.load %arg2[%c0_2, %c0_3, %c0_4] : memref<2x12x32xf32, #tpu.memory_space<vmem>>, vector<2x12x32xf32>
    %c0_5 = arith.constant 0 : index
    %c0_6 = arith.constant 0 : index
    %c0_7 = arith.constant 0 : index
    %2 = vector.load %arg3[%c0_5, %c0_6, %c0_7] : memref<2x10x32xf32, #tpu.memory_space<vmem>>, vector<2x10x32xf32>
    %c0_8 = arith.constant 0 : index
    %c0_9 = arith.constant 0 : index
    %c0_10 = arith.constant 0 : index
    %3 = vector.load %arg4[%c0_8, %c0_9, %c0_10] : memref<2x10x32xf32, #tpu.memory_space<vmem>>, vector<2x10x32xf32>
    %cst = arith.constant 0.000000e+00 : f32
    %4 = vector.broadcast %cst : f32 to vector<2x64x32xf32>
    %c0_11 = arith.constant 0 : index
    %c0_12 = arith.constant 0 : index
    %c0_13 = arith.constant 0 : index
    %5 = vector.load %arg11[%c0_11, %c0_12, %c0_13] : memref<2x64x32xf32, #tpu.memory_space<vmem>>, vector<2x64x32xf32>
    tpu.vector_store %arg11[%c0_11, %c0_12, %c0_13], %4 {strides = array<i32>} : memref<2x64x32xf32, #tpu.memory_space<vmem>>, vector<2x64x32xf32>,
    %c0_14 = arith.constant 0 : index
    %c0_15 = arith.constant 0 : index
    %c0_16 = arith.constant 0 : index
    %6 = vector.load %arg11[%c0_14, %c0_15, %c0_16] : memref<2x64x32xf32, #tpu.memory_space<vmem>>, vector<2x16x32xf32>
    tpu.vector_store %arg11[%c0_14, %c0_15, %c0_16], %0 {strides = array<i32>} : memref<2x64x32xf32, #tpu.memory_space<vmem>>, vector<2x16x32xf32>,
    %c0_17 = arith.constant 0 : index
    %c16 = arith.constant 16 : index
    %c0_18 = arith.constant 0 : index
    %7 = vector.load %arg11[%c0_17, %c16, %c0_18] : memref<2x64x32xf32, #tpu.memory_space<vmem>>, vector<2x12x32xf32>
    tpu.vector_store %arg11[%c0_17, %c16, %c0_18], %1 {strides = array<i32>} : memref<2x64x32xf32, #tpu.memory_space<vmem>>, vector<2x12x32xf32>,
    %c0_19 = arith.constant 0 : index
    %c32 = arith.constant 32 : index
    %c0_20 = arith.constant 0 : index
    %8 = vector.load %arg11[%c0_19, %c32, %c0_20] : memref<2x64x32xf32, #tpu.memory_space<vmem>>, vector<2x10x32xf32>
    tpu.vector_store %arg11[%c0_19, %c32, %c0_20], %2 {strides = array<i32>} : memref<2x64x32xf32, #tpu.memory_space<vmem>>, vector<2x10x32xf32>,
    %c0_21 = arith.constant 0 : index
    %c48 = arith.constant 48 : index
    %c0_22 = arith.constant 0 : index
    %9 = vector.load %arg11[%c0_21, %c48, %c0_22] : memref<2x64x32xf32, #tpu.memory_space<vmem>>, vector<2x10x32xf32>
    tpu.vector_store %arg11[%c0_21, %c48, %c0_22], %3 {strides = array<i32>} : memref<2x64x32xf32, #tpu.memory_space<vmem>>, vector<2x10x32xf32>,
    %c0_23 = arith.constant 0 : index
    %c0_24 = arith.constant 0 : index
    %c0_25 = arith.constant 0 : index
    %10 = vector.load %arg11[%c0_23, %c0_24, %c0_25] : memref<2x64x32xf32, #tpu.memory_space<vmem>>, vector<2x64x32xf32>
    %11 = vector.shape_cast %10 : vector<2x64x32xf32> to vector<128x32xf32>
    %c0_26 = arith.constant 0 : index
    %c0_27 = arith.constant 0 : index
    %12 = vector.load %arg5[%c0_26, %c0_27] : memref<32x96xf32, #tpu.memory_space<vmem>>, vector<32x96xf32>
    %cst_28 = arith.constant dense<0.000000e+00> : vector<128x96xf32>
    %13 = tpu.matmul %11, %12, %cst_28 {dimension_numbers = #tpu.dot_dimension_numbers<[1], [0], [0], [1], [0, 0, 1, 1], [], []>} : vector<128x32xf32>, vector<32x96xf32>, vector<128x96xf32> -> vector<128x96xf32>
    %14 = vector.shape_cast %13 : vector<128x96xf32> to vector<2x64x96xf32>
    %15 = vector.extract_strided_slice %14 {offsets = [0, 0, 0], sizes = [2, 64, 32], strides = [1, 1, 1]} : vector<2x64x96xf32> to vector<2x64x32xf32>
    %16 = vector.extract_strided_slice %14 {offsets = [0, 0, 64], sizes = [2, 16, 32], strides = [1, 1, 1]} : vector<2x64x96xf32> to vector<2x16x32xf32>
    %17 = vector.extract_strided_slice %14 {offsets = [0, 16, 32], sizes = [2, 48, 32], strides = [1, 1, 1]} : vector<2x64x96xf32> to vector<2x48x32xf32>
    %18 = vector.extract_strided_slice %15 {offsets = [0, 16, 0], sizes = [2, 48, 32], strides = [1, 1, 1]} : vector<2x64x32xf32> to vector<2x48x32xf32>
    %19 = vector.shape_cast %16 : vector<2x16x32xf32> to vector<32x32xf32>
    %20 = vector.shape_cast %17 : vector<2x48x32xf32> to vector<96x32xf32>
    %21 = vector.shape_cast %18 : vector<2x48x32xf32> to vector<96x32xf32>
    %cst_29 = arith.constant dense<0.000000e+00> : vector<32x96xf32>
    %22 = tpu.matmul %19, %20, %cst_29 {dimension_numbers = #tpu.dot_dimension_numbers<[1], [1], [0], [0], [0, 0, 1, 0], [], []>} : vector<32x32xf32>, vector<96x32xf32>, vector<32x96xf32> -> vector<32x96xf32>
    %c0_30 = arith.constant 0 : index
    %c0_31 = arith.constant 0 : index
    %23 = vector.load %arg6[%c0_30, %c0_31] : memref<32x96xf32, #tpu.memory_space<vmem>>, vector<32x96xf32>
    %24 = arith.addf %22, %23 : vector<32x96xf32>
    %cst_32 = arith.constant dense<0xFF800000> : vector<32xf32>
    %25 = vector.multi_reduction <maximumf>, %24, %cst_32 [1] : vector<32x96xf32> to vector<32xf32>
    %26 = vector.shape_cast %25 : vector<32xf32> to vector<32x1xf32>
    %27 = vector.broadcast %26 : vector<32x1xf32> to vector<32x96xf32>
    %28 = arith.subf %24, %27 : vector<32x96xf32>
    %29 = math.exp %28 : vector<32x96xf32>
    %cst_33 = arith.constant dense<0.000000e+00> : vector<32xf32>
    %30 = vector.multi_reduction <add>, %29, %cst_33 [1] : vector<32x96xf32> to vector<32xf32>
    %31 = vector.shape_cast %30 : vector<32xf32> to vector<32x1xf32>
    %cst_34 = arith.constant dense<0.000000e+00> : vector<32x32xf32>
    %32 = tpu.matmul %29, %21, %cst_34 {dimension_numbers = #tpu.dot_dimension_numbers<[1], [0], [0], [1], [0, 0, 1, 1], [], []>} : vector<32x96xf32>, vector<96x32xf32>, vector<32x32xf32> -> vector<32x32xf32>
    %33 = tpu.reciprocal %31 {approx = true} : vector<32x1xf32> -> vector<32x1xf32>
    %34 = arith.mulf %31, %33 : vector<32x1xf32>
    %cst_35 = arith.constant 2.000000e+00 : f32
    %35 = vector.broadcast %cst_35 : f32 to vector<32x1xf32>
    %36 = arith.subf %35, %34 : vector<32x1xf32>
    %37 = arith.mulf %33, %36 : vector<32x1xf32>
    %38 = vector.broadcast %37 : vector<32x1xf32> to vector<32x32xf32>
    %39 = arith.mulf %32, %38 : vector<32x32xf32>
    %40 = vector.shape_cast %39 : vector<32x32xf32> to vector<2x16x32xf32>
    %c0_36 = arith.constant 0 : index
    %c0_37 = arith.constant 0 : index
    %41 = vector.load %arg0[%c0_36, %c0_37] : memref<2x1xi32, #tpu.memory_space<vmem>>, vector<2x1xi32>
    %42 = tpu.iota {dimensions = array<i32: 1>} : vector<2x16x1xi32>
    %43 = vector.shape_cast %41 : vector<2x1xi32> to vector<2x1x1xi32>
    %44 = vector.broadcast %43 : vector<2x1x1xi32> to vector<2x16x1xi32>
    %45 = arith.cmpi slt, %42, %44 : vector<2x16x1xi32>
    %cst_38 = arith.constant 0.000000e+00 : f32
    %46 = vector.shape_cast %45 : vector<2x16x1xi1> to vector<2x16x1xi1>
    %47 = vector.broadcast %46 : vector<2x16x1xi1> to vector<2x16x32xi1>
    %48 = vector.broadcast %cst_38 : f32 to vector<2x16x32xf32>
    %49 = arith.select %47, %40, %48 : vector<2x16x32xi1>, vector<2x16x32xf32>
    %50 = arith.addf %0, %49 : vector<2x16x32xf32>
    %c0_39 = arith.constant 0 : index
    %c0_40 = arith.constant 0 : index
    %c0_41 = arith.constant 0 : index
    %51 = vector.load %arg7[%c0_39, %c0_40, %c0_41] : memref<2x16x32xf32, #tpu.memory_space<vmem>>, vector<2x16x32xf32>
    tpu.vector_store %arg7[%c0_39, %c0_40, %c0_41], %50 {strides = array<i32>} : memref<2x16x32xf32, #tpu.memory_space<vmem>>, vector<2x16x32xf32>,
    %52 = vector.extract_strided_slice %15 {offsets = [0, 16, 0], sizes = [2, 12, 32], strides = [1, 1, 1]} : vector<2x64x32xf32> to vector<2x12x32xf32>
    %53 = arith.addf %1, %52 : vector<2x12x32xf32>
    %c0_42 = arith.constant 0 : index
    %c0_43 = arith.constant 0 : index
    %c0_44 = arith.constant 0 : index
    %54 = vector.load %arg8[%c0_42, %c0_43, %c0_44] : memref<2x12x32xf32, #tpu.memory_space<vmem>>, vector<2x12x32xf32>
    tpu.vector_store %arg8[%c0_42, %c0_43, %c0_44], %53 {strides = array<i32>} : memref<2x12x32xf32, #tpu.memory_space<vmem>>, vector<2x12x32xf32>,
    %55 = vector.extract_strided_slice %15 {offsets = [0, 32, 0], sizes = [2, 10, 32], strides = [1, 1, 1]} : vector<2x64x32xf32> to vector<2x10x32xf32>
    %56 = arith.addf %2, %55 : vector<2x10x32xf32>
    %c0_45 = arith.constant 0 : index
    %c0_46 = arith.constant 0 : index
    %c0_47 = arith.constant 0 : index
    %57 = vector.load %arg9[%c0_45, %c0_46, %c0_47] : memref<2x10x32xf32, #tpu.memory_space<vmem>>, vector<2x10x32xf32>
    tpu.vector_store %arg9[%c0_45, %c0_46, %c0_47], %56 {strides = array<i32>} : memref<2x10x32xf32, #tpu.memory_space<vmem>>, vector<2x10x32xf32>,
    %58 = vector.extract_strided_slice %15 {offsets = [0, 48, 0], sizes = [2, 10, 32], strides = [1, 1, 1]} : vector<2x64x32xf32> to vector<2x10x32xf32>
    %59 = arith.addf %3, %58 : vector<2x10x32xf32>
    %c0_48 = arith.constant 0 : index
    %c0_49 = arith.constant 0 : index
    %c0_50 = arith.constant 0 : index
    %60 = vector.load %arg10[%c0_48, %c0_49, %c0_50] : memref<2x10x32xf32, #tpu.memory_space<vmem>>, vector<2x10x32xf32>
    tpu.vector_store %arg10[%c0_48, %c0_49, %c0_50], %59 {strides = array<i32>} : memref<2x10x32xf32, #tpu.memory_space<vmem>>, vector<2x10x32xf32>,
    return
  }
}

</mosaic_0001>

<bundles_post_ra>
// kernel: self_attention_layer.1
= control target key start
LH: loop header
LB: loop body
LE: loop exit
PB: predicated region body
PF: predicated region fallthrough
CT: control target
= control target key end

     0   :  { %vm46_vm0 = vcmask 261120   ;;  %v1029_v3 = vmov 0.0   ;;  %vm68_vm1 = vcmask 257024   ;;  %vm73_vm2 = vcmask 254976   ;;  %s1030_s11 = smov 96   ;;  %s1031_s27 = smov 64   ;;  %s1411_s5 = inlined_call_operand.vmem [shape: f32[32,96], index: 5, kind: input, shape index: {}]   ;;  %s1412_s1 = inlined_call_operand.vmem [shape: f32[2,16,32], index: 1, kind: input, shape index: {}, may-alias: {1,7}]   ;;  %s1413_s2 = inlined_call_operand.vmem [shape: f32[2,12,32], index: 2, kind: input, shape index: {}, may-alias: {2,8}]   ;;  %s1414_s3 = inlined_call_operand.vmem [shape: f32[2,10,32], index: 3, kind: input, shape index: {}, may-alias: {3,9}]   ;;  %s1415_s4 = inlined_call_operand.vmem [shape: f32[2,10,32], index: 4, kind: input, shape index: {}, may-alias: {4,10}]   ;;  %s1416_s8 = inlined_call_operand.vmem [shape: f32[2,12,32], index: 8, kind: output, shape index: {1}, may-alias: {2,8}]   ;;  %s1417_s9 = inlined_call_operand.vmem [shape: f32[2,10,32], index: 9, kind: output, shape index: {2}, may-alias: {3,9}]   ;;  %s1418_s10 = inlined_call_operand.vmem [shape: f32[2,10,32], index: 10, kind: output, shape index: {3}, may-alias: {4,10}]   ;;  %s1419_s6 = inlined_call_operand.vmem [shape: f32[32,96], index: 6, kind: input, shape index: {}]   ;;  %s1420_s0 = inlined_call_operand.vmem [shape: s32[2,1], index: 0, kind: input, shape index: {}]   ;;  %s1421_s7 = inlined_call_operand.vmem [shape: f32[2,16,32], index: 7, kind: output, shape index: {0}, may-alias: {1,7}]  }
   0x1   :  { %v97_v0 = vld [vmem:[%s1411_s5] sm:$0xff]  ;;  %v98_v1 = vld [vmem:[%s1411_s5 + $0x8] sm:$0xff]  ;;  %v99_v2 = vld [vmem:[%s1411_s5 + $0x10] sm:$0xff]  ;;  %47 = vst.msk [vmem:[#allocation2] sm:$0xff] %vm46_vm0, %v1029_v3  ;;  %vm463_vm4 = vcmask 785408  }
   0x2   :  { %48 = vst.msk [vmem:[#allocation2 + $0x8] sm:$0xff] %vm46_vm0, %v1029_v3  ;;  %49 = vst.msk [vmem:[#allocation2 + $0x10] sm:$0xff] %vm46_vm0, %v1029_v3  ;;  %v908_v4 = vpack.c.bf16 %v98_v1, %v97_v0  ;;  %v100_v5 = vld [vmem:[%s1411_s5 + $0x18] sm:$0xff]  ;;  %v1120_v6 = vld [vmem:[%s1412_s1] sm:$0xff] }
   0x3   :  { %50 = vst.msk [vmem:[#allocation2 + $0x18] sm:$0xff] %vm46_vm0, %v1029_v3  ;;  %51 = vst.msk [vmem:[#allocation2 + $0x20] sm:$0xff] %vm46_vm0, %v1029_v3  ;;  %v1125_v7 = vld [vmem:[%s1412_s1 + $0x8] sm:$0xff]  ;;  %v912_v8 = vpack.c.bf16 %v100_v5, %v99_v2  ;;  %v1134_v9 = vld [vmem:[%s1413_s2] sm:$0xff] }
   0x4   :  { %52 = vst.msk [vmem:[#allocation2 + $0x28] sm:$0xff] %vm46_vm0, %v1029_v3  ;;  %53 = vst.msk [vmem:[#allocation2 + $0x30] sm:$0xff] %vm46_vm0, %v1029_v3  ;;  %v1139_v10 = vld [vmem:[%s1413_s2 + $0x8] sm:$0xf]  ;;  %v1144_v11 = vld [vmem:[%s1414_s3] sm:$0xff]  ;;  %909 = vmatprep.subr.bf16.mxu0 %v908_v4 }
   0x5   :  { %54 = vst.msk [vmem:[#allocation2 + $0x38] sm:$0xff] %vm46_vm0, %v1029_v3  ;;  %55 = vst.msk [vmem:[#allocation2 + $0x40] sm:$0xff] %vm46_vm0, %v1029_v3  ;;  %v1155_v12 = vld [vmem:[%s1414_s3 + $0x8] sm:$0x3]  ;;  %v1160_v13 = vld [vmem:[%s1415_s4] sm:$0xff]  ;;  %911 = vmatpush3.bf16.msra.mxu0 %v908_v4 }
   0x6   :  { %56 = vst.msk [vmem:[#allocation2 + $0x48] sm:$0xff] %vm46_vm0, %v1029_v3  ;;  %57 = vst.msk [vmem:[#allocation2 + $0x50] sm:$0xff] %vm46_vm0, %v1029_v3  ;;  %v1165_v14 = vld [vmem:[%s1415_s4 + $0x8] sm:$0x3]  ;;  %v1176_v15 = vld [vmem:[%s1412_s1 + $0x10] sm:$0xff]  ;;  %913 = vmatprep.subr.bf16.mxu0 %v912_v8 }
   0x7   :  { %58 = vst.msk [vmem:[#allocation2 + $0x58] sm:$0xff] %vm46_vm0, %v1029_v3  ;;  %59 = vst.msk [vmem:[#allocation2 + $0x60] sm:$0xff] %vm46_vm0, %v1029_v3  ;;  %v1181_v16 = vld [vmem:[%s1412_s1 + $0x18] sm:$0xff]  ;;  %v1186_v17 = vld [vmem:[%s1413_s2 + $0x10] sm:$0xff] }
   0x8   :  { %60 = vst.msk [vmem:[#allocation2 + $0x68] sm:$0xff] %vm46_vm0, %v1029_v3  ;;  %61 = vst.msk [vmem:[#allocation2 + $0x70] sm:$0xff] %vm46_vm0, %v1029_v3  ;;  %v1197_v18 = vld [vmem:[%s1413_s2 + $0x18] sm:$0xf]  ;;  %v1202_v19 = vld [vmem:[%s1414_s3 + $0x10] sm:$0xff] }
   0x9   :  { %62 = vst.msk [vmem:[#allocation2 + $0x78] sm:$0xff] %vm46_vm0, %v1029_v3  ;;  %63 = vst.msk [vmem:[#allocation2] sm:$0xff] %vm46_vm0, %v1120_v6  ;;  %v1207_v20 = vld [vmem:[%s1414_s3 + $0x18] sm:$0x3]  ;;  %v1218_v21 = vld [vmem:[%s1415_s4 + $0x10] sm:$0xff]  ;;  %915 = vmatpush3.bf16.msra.mxu0 %v912_v8 }
   0xa   :  { %64 = vst.msk [vmem:[#allocation2 + $0x8] sm:$0xff] %vm46_vm0, %v1125_v7  ;;  %67 = vst.msk [vmem:[#allocation2 + $0x10] sm:$0xff] %vm46_vm0, %v1134_v9  ;;  %v1223_v22 = vld [vmem:[%s1415_s4 + $0x18] sm:$0x3] }
   0xb   :  { %69 = vst.msk [vmem:[#allocation2 + $0x18] sm:$0xf] %vm68_vm1, %v1139_v10  ;;  %71 = vst.msk [vmem:[#allocation2 + $0x58] sm:$0xf] %vm68_vm1, %v1197_v18 }
   0xc   :  { %72 = vst.msk [vmem:[#allocation2 + $0x20] sm:$0xff] %vm46_vm0, %v1144_v11  ;;  %77 = vst.msk [vmem:[#allocation2 + $0x30] sm:$0xff] %vm46_vm0, %v1160_v13 }
   0xd   :  { %74 = vst.msk [vmem:[#allocation2 + $0x28] sm:$0x3] %vm73_vm2, %v1155_v12  ;;  %78 = vst.msk [vmem:[#allocation2 + $0x38] sm:$0x3] %vm73_vm2, %v1165_v14 }
   0xe   :  { %65 = vst.msk [vmem:[#allocation2 + $0x40] sm:$0xff] %vm46_vm0, %v1176_v15  ;;  %66 = vst.msk [vmem:[#allocation2 + $0x48] sm:$0xff] %vm46_vm0, %v1181_v16 }
   0xf   :  { %70 = vst.msk [vmem:[#allocation2 + $0x50] sm:$0xff] %vm46_vm0, %v1186_v17  ;;  %75 = vst.msk [vmem:[#allocation2 + $0x60] sm:$0xff] %vm46_vm0, %v1202_v19 }
  0x10   :  { %76 = vst.msk [vmem:[#allocation2 + $0x68] sm:$0x3] %vm73_vm2, %v1207_v20  ;;  %80 = vst.msk [vmem:[#allocation2 + $0x78] sm:$0x3] %vm73_vm2, %v1223_v22  ;;  %v81_v23 = vld [vmem:[#allocation2] sm:$0xff] }
  0x11   :  { %79 = vst.msk [vmem:[#allocation2 + $0x70] sm:$0xff] %vm46_vm0, %v1218_v21  ;;  %v82_v24 = vld [vmem:[#allocation2 + $0x8] sm:$0xff]  ;;  %824 = vmatprep.mubr.msk.f32.mxu0 %vm46_vm0, %v81_v23  ;;  %v83_v25 = vld [vmem:[#allocation2 + $0x10] sm:$0xff]  ;;  %vm1319_vm3 = vmpackc.low %vm46_vm0, %vm46_vm0 }
  0x12   :  { %825 = vmatmul.mubr.msk.f32.vlgmr.msra.gmra.mrb[0].mxu0 %vm46_vm0, %v82_v24  ;;  %v84_v26 = vld [vmem:[#allocation2 + $0x18] sm:$0xff] }
  0x13   :  { %827 = vmatprep.mubr.msk.f32.mxu0 %vm46_vm0, %v83_v25  ;;  %v85_v27 = vld [vmem:[#allocation2 + $0x20] sm:$0xff]  ;;  %v87_v29 = vld [vmem:[#allocation2 + $0x30] sm:$0xff]  ;;  %v92_v34 = vld [vmem:[#allocation2 + $0x58] sm:$0xff] }
  0x14   :  { %v86_v28 = vld [vmem:[#allocation2 + $0x28] sm:$0xff]  ;;  %v88_v30 = vld [vmem:[#allocation2 + $0x38] sm:$0xff] }
  0x15   :  { %v89_v31 = vld [vmem:[#allocation2 + $0x40] sm:$0xff]  ;;  %v90_v32 = vld [vmem:[#allocation2 + $0x48] sm:$0xff] }
  0x16   :  { %828 = vmatmul.mubr.msk.f32.gmra.mrb[2].mxu0 %vm46_vm0, %v84_v26  ;;  %v91_v33 = vld [vmem:[#allocation2 + $0x50] sm:$0xff]  ;;  %v93_v35 = vld [vmem:[#allocation2 + $0x60] sm:$0xff] }
  0x17   :  { %830 = vmatprep.mubr.msk.f32.mxu0 %vm46_vm0, %v85_v27  ;;  %v94_v36 = vld [vmem:[#allocation2 + $0x68] sm:$0xff]  ;;  %v96_v38 = vld [vmem:[#allocation2 + $0x78] sm:$0xff] }
  0x18   :  { %v95_v37 = vld [vmem:[#allocation2 + $0x70] sm:$0xff] }
  0x1a   :  { %831 = vmatmul.mubr.msk.f32.gmra.mrb[4].mxu0 %vm46_vm0, %v86_v28 }
  0x1b   :  { %833 = vmatprep.mubr.msk.f32.mxu0 %vm46_vm0, %v87_v29 }
  0x1e   :  { %834 = vmatmul.mubr.msk.f32.gmra.mrb[6].mxu0 %vm46_vm0, %v88_v30 }
  0x1f   :  { %836 = vmatprep.mubr.msk.f32.mxu0 %vm46_vm0, %v89_v31 }
  0x22   :  { %837 = vmatmul.mubr.msk.f32.gmra.mrb[8].mxu0 %vm46_vm0, %v90_v32 }
  0x23   :  { %839 = vmatprep.mubr.msk.f32.mxu0 %vm46_vm0, %v91_v33 }
  0x26   :  { %840 = vmatmul.mubr.msk.f32.gmra.mrb[10].mxu0 %vm46_vm0, %v92_v34 }
  0x27   :  { %842 = vmatprep.mubr.msk.f32.mxu0 %vm46_vm0, %v93_v35 }
  0x2a   :  { %843 = vmatmul.mubr.msk.f32.gmra.mrb[12].mxu0 %vm46_vm0, %v94_v36 }
  0x2b   :  { %845 = vmatprep.mubr.msk.f32.mxu0 %vm46_vm0, %v95_v37 }
  0x2e   :  { %846 = vmatmul.mubr.msk.f32.gmra.mrb[14].mxu0 %vm46_vm0, %v96_v38 }
  0xe5   :  { %v1245_v39 = vpop.f32.mrb[0].mxu0 }
  0xe6   :  { %v1247_v40 = vpop.f32.mrb[1].mxu0 }
  0xe9   :  { %v829_v41 = vpop.f32.mrb[2].mxu0 }
  0xea   :  { %v688_v42 = vadd.f32 %v829_v41, %v1139_v10  ;;  %v225_v43 = vpop.f32.mrb[3].mxu0 }
  0xeb   :  { %v952_v44 = vpack.c.bf16 %v829_v41, %v225_v43  ;;  %v687_v45 = vadd.f32 %v225_v43, %v1134_v9  ;;  %v981_v46 = vpack.i.bf16 %v829_v41, %v225_v43 }
  0xec   :  { %692 = vst.msk [vmem:[%s1416_s8 + $0x8] sm:$0xf] %vm68_vm1, %v688_v42 }
  0xed   :  { %691 = vst.msk [vmem:[%s1416_s8] sm:$0xff] %vm46_vm0, %v687_v45  ;;  %982 = vrot.lane.b32.xlu0 %v981_v46, %s1030_s11  ;;  %953 = vmatprep.subr.bf16.mxu0 %v952_v44  ;;  %v832_v47 = vpop.f32.mrb[4].mxu0 }
  0xee   :  { %955 = vmatpush3.bf16.msra.mxu0 %v952_v44  ;;  %v696_v48 = vadd.f32 %v832_v47, %v1155_v12  ;;  %v235_v49 = vpop.f32.mrb[5].mxu0 }
  0xef   :  { %v986_v50 = vpack.i.bf16 %v832_v47, %v235_v49  ;;  %v956_v51 = vpack.c.bf16 %v832_v47, %v235_v49  ;;  %v695_v52 = vadd.f32 %v235_v49, %v1144_v11  ;;  %v618_v49 = vlaneseq }
  0xf0   :  { %700 = vst.msk [vmem:[%s1417_s9 + $0x8] sm:$0x3] %vm73_vm2, %v696_v48  ;;  %v1032_v48 = vmov 0  }
  0xf1   :  { %699 = vst.msk [vmem:[%s1417_s9] sm:$0xff] %vm46_vm0, %v695_v52  ;;  %957 = vmatprep.subr.bf16.mxu0 %v956_v51  ;;  %987 = vrot.lane.b32.xlu0 %v986_v50, %s1030_s11  ;;  %v835_v53 = vpop.f32.mrb[6].mxu0  ;;  %v1033_v50 = vmov 1966171168   ;;  %v295_v52 = vld [vmem:[%s1419_s6 + $0x8] sm:$0xff] }
  0xf2   :  { %959 = vmatpush3.bf16.msra.mxu0 %v956_v51  ;;  %v704_v54 = vadd.f32 %v835_v53, %v1165_v14  ;;  %v245_v55 = vpop.f32.mrb[7].mxu0  ;;  %1011 = vset.pattern.permute.xlu1 %v1032_v48  ;;  %v630_v51 = vunpack.c.l.s4 %v1033_v50 }
  0xf3   :  { %v960_v56 = vpack.c.bf16 %v835_v53, %v245_v55  ;;  %v703_v57 = vadd.f32 %v245_v55, %v1160_v13  ;;  %v991_v58 = vpack.i.bf16 %v835_v53, %v245_v55  ;;  %1012 = vset.pattern.permute.xlu0 %v1032_v48  ;;  %v294_v53 = vld [vmem:[%s1419_s6] sm:$0xff] }
  0xf4   :  { %708 = vst.msk [vmem:[%s1418_s10 + $0x8] sm:$0x3] %vm73_vm2, %v704_v54  ;;  %v1359_v54 = vshrl.u32 %v618_v49, 7  ;;  %v631_v55 = vunpack.c.0.s8 %v630_v51 }
  0xf5   :  { %707 = vst.msk [vmem:[%s1418_s10] sm:$0xff] %vm46_vm0, %v703_v57  ;;  %v838_v59 = vpop.f32.mrb[8].mxu0  ;;  %961 = vmatprep.subr.bf16.mxu0 %v960_v56  ;;  %992 = vrot.lane.b32.xlu1 %v991_v58, %s1030_s11 }
  0xf6   :  { %v255_v60 = vpop.f32.mrb[9].mxu0  ;;  %963 = vmatpush3.bf16.msra.mxu0 %v960_v56 }
  0xf9   :  { %v841_v61 = vpop.f32.mrb[10].mxu0 }
  0xfa   :  { %v690_v62 = vadd.f32 %v841_v61, %v1197_v18  ;;  %v265_v63 = vpop.f32.mrb[11].mxu0 }
  0xfb   :  { %v996_v0 = vpack.i.bf16 %v841_v61, %v265_v63  ;;  %v964_v1 = vpack.c.bf16 %v841_v61, %v265_v63  ;;  %v689_v2 = vadd.f32 %v265_v63, %v1186_v17  ;;  %v296_v61 = vld [vmem:[%s1419_s6 + $0x10] sm:$0xff] }
  0xfc   :  { %694 = vst.msk [vmem:[%s1416_s8 + $0x18] sm:$0xf] %vm68_vm1, %v690_v62  ;;  %v634_v62 = vsub.s32 %v631_v55, %v1359_v54 }
  0xfd   :  { %693 = vst.msk [vmem:[%s1416_s8 + $0x10] sm:$0xff] %vm46_vm0, %v689_v2  ;;  %v844_v3 = vpop.f32.mrb[12].mxu0  ;;  %997 = vrot.lane.b32.xlu1 %v996_v0, %s1030_s11  ;;  %965 = vmatprep.subr.bf16.mxu0 %v964_v1  ;;  %v297_v2 = vld [vmem:[%s1419_s6 + $0x18] sm:$0xff] }
  0xfe   :  { %v698_v4 = vadd.f32 %v844_v3, %v1207_v20  ;;  %v275_v5 = vpop.f32.mrb[13].mxu0  ;;  %967 = vmatpush3.bf16.msra.mxu0 %v964_v1  ;;  %v763_v1 = vld.sshfl [vmem:[%s1420_s0] sm:$0x11 pattern:$0x75316420] }
  0xff   :  { %v1001_v8 = vpack.i.bf16 %v844_v3, %v275_v5  ;;  %v968_v9 = vpack.c.bf16 %v844_v3, %v275_v5  ;;  %v697_v10 = vadd.f32 %v275_v5, %v1202_v19  ;;  %v635_v5 = vrot.slane %v763_v1, %v634_v62 }
 0x100   :  { %702 = vst.msk [vmem:[%s1417_s9 + $0x18] sm:$0x3] %vm73_vm2, %v698_v4 }
 0x101   :  { %701 = vst.msk [vmem:[%s1417_s9 + $0x10] sm:$0xff] %vm46_vm0, %v697_v10  ;;  %1002 = vrot.lane.b32.xlu0 %v1001_v8, %s1030_s11  ;;  %v847_v11 = vpop.f32.mrb[14].mxu0  ;;  %969 = vmatprep.subr.bf16.mxu0 %v968_v9  ;;  %v645_v8 = vsub.s32 0, %v1359_v54 }
 0x102   :  { %v706_v12 = vadd.f32 %v847_v11, %v1223_v22  ;;  %v285_v13 = vpop.f32.mrb[15].mxu0  ;;  %971 = vmatpush3.bf16.msra.mxu0 %v968_v9 }
 0x103   :  { %v1006_v14 = vpack.i.bf16 %v847_v11, %v285_v13  ;;  %v972_v17 = vpack.c.bf16 %v847_v11, %v285_v13  ;;  %v705_v18 = vadd.f32 %v285_v13, %v1218_v21  ;;  %v646_v11 = vrot.slane %v635_v5, %v645_v8 }
 0x104   :  { %710 = vst.msk [vmem:[%s1418_s10 + $0x18] sm:$0x3] %vm73_vm2, %v706_v12 }
 0x105   :  { %709 = vst.msk [vmem:[%s1418_s10 + $0x10] sm:$0xff] %vm46_vm0, %v705_v18  ;;  %302 = vrot.lane.b32.xlu0 %v1247_v40, %s1031_s27  ;;  %1007 = vrot.lane.b32.xlu1 %v1006_v14, %s1030_s11  ;;  %vm651_vm5 = vcmp.lt.s32.totalorder %v1359_v54, %v646_v11 }
 0x106   :  { %973 = vmatprep.subr.bf16.mxu0 %v972_v17  ;;  %v655_v13 = vsel %vm651_vm5, 1, %v1032_v48 }
 0x107   :  { %975 = vmatpush3.bf16.msra.mxu0 %v972_v17 }
 0x109   :  { %306 = vrot.lane.b32.xlu0 %v255_v60, %s1031_s27  ;;  %304 = vrot.lane.b32.xlu1 %v1245_v39, %s1031_s27 }
 0x10d   :  { %308 = vrot.lane.b32.xlu1 %v838_v59, %s1031_s27 }
 0x15f   :  { %v983_v19 = vpop.permute.xlu0 %982 }
 0x160   :  { %v985_v20 = vunpack.i.h.bf16 %v983_v19  ;;  %v984_v21 = vunpack.i.l.bf16 %v983_v19 }
 0x162   :  { %v916_v23 = vpack.c.bf16 %v985_v20, %v984_v21 }
 0x163   :  { %v988_v24 = vpop.permute.xlu0 %987 }
 0x164   :  { %918 = vmatprep.subr.msk.bf16.mxu1 %vm1319_vm3, %v916_v23  ;;  %v990_v25 = vunpack.i.h.bf16 %v988_v24  ;;  %v989_v26 = vunpack.i.l.bf16 %v988_v24 }
 0x165   :  { %921 = vmatpush3.bf16.xpose.msk.msra.mxu1 %vm1319_vm3, %v916_v23 }
 0x166   :  { %v922_v27 = vpack.c.bf16 %v990_v25, %v989_v26 }
 0x167   :  { %v993_v28 = vpop.permute.xlu1 %992 }
 0x168   :  { %924 = vmatprep.subr.msk.bf16.mxu1 %vm1319_vm3, %v922_v27  ;;  %v995_v29 = vunpack.i.h.bf16 %v993_v28  ;;  %v994_v30 = vunpack.i.l.bf16 %v993_v28 }
 0x16a   :  { %v928_v31 = vpack.c.bf16 %v995_v29, %v994_v30 }
 0x16d   :  { %927 = vmatpush3.bf16.xpose.msk.msra.mxu1 %vm1319_vm3, %v922_v27 }
 0x16e   :  { %930 = vmatprep.subr.msk.bf16.mxu1 %vm1319_vm3, %v928_v31 }
 0x16f   :  { %v998_v32 = vpop.permute.xlu1 %997 }
 0x170   :  { %v1000_v33 = vunpack.i.h.bf16 %v998_v32  ;;  %v999_v34 = vunpack.i.l.bf16 %v998_v32  ;;  %v628_v32 = vcombine.high %v763_v1, %v763_v1 }
 0x172   :  { %v934_v35 = vpack.c.bf16 %v1000_v33, %v999_v34  ;;  %v642_v34 = vrot.slane %v628_v32, %v634_v62 }
 0x173   :  { %v1003_v36 = vpop.permute.xlu0 %1002 }
 0x174   :  { %v1005_v37 = vunpack.i.h.bf16 %v1003_v36  ;;  %v1004_v38 = vunpack.i.l.bf16 %v1003_v36 }
 0x175   :  { %933 = vmatpush3.bf16.xpose.msk.msra.mxu1 %vm1319_vm3, %v928_v31 }
 0x176   :  { %936 = vmatprep.subr.msk.bf16.mxu1 %vm1319_vm3, %v934_v35  ;;  %v940_v40 = vpack.c.bf16 %v1005_v37, %v1004_v38  ;;  %v650_v37 = vrot.slane %v642_v34, %v645_v8 }
 0x177   :  { %v303_v39 = vpop.permute.xlu0 %302  ;;  %v1008_v41 = vpop.permute.xlu1 %1007 }
 0x178   :  { %872 = vmatprep.mubr.msk.f32.mxu1 %vm46_vm0, %v303_v39  ;;  %v1010_v42 = vunpack.i.h.bf16 %v1008_v41  ;;  %v1009_v43 = vunpack.i.l.bf16 %v1008_v41  ;;  %vm653_vm6 = vcmp.lt.s32.totalorder %v1359_v54, %v650_v37  ;;  %v620_v39 = vadd.s32 8, %v1359_v54 }
 0x179   :  { %v657_v38 = vsel %vm653_vm6, 1, %v1032_v48 }
 0x17a   :  { %v946_v44 = vpack.c.bf16 %v1010_v42, %v1009_v43  ;;  %vm652_vm7 = vcmp.lt.s32.totalorder %v620_v39, %v646_v11  ;;  %vm654_vm8 = vcmp.lt.s32.totalorder %v620_v39, %v650_v37 }
 0x17b   :  { %v305_v45 = vpop.permute.xlu1 %304  ;;  %v307_v46 = vpop.permute.xlu0 %306  ;;  %v658_v42 = vsel %vm654_vm8, 1, %v1032_v48 }
 0x17d   :  { %939 = vmatpush3.bf16.xpose.msk.msra.mxu1 %vm1319_vm3, %v934_v35 }
 0x17e   :  { %942 = vmatprep.subr.msk.bf16.mxu1 %vm1319_vm3, %v940_v40 }
 0x17f   :  { %v309_v47 = vpop.permute.xlu1 %308 }
 0x185   :  { %945 = vmatpush3.bf16.xpose.msk.msra.mxu1 %vm1319_vm3, %v940_v40  ;;  %v656_v40 = vsel %vm652_vm7, 1, %v1032_v48 }
 0x186   :  { %948 = vmatprep.subr.msk.bf16.mxu1 %vm1319_vm3, %v946_v44 }
 0x18d   :  { %951 = vmatpush3.bf16.xpose.msk.msra.mxu1 %vm1319_vm3, %v946_v44 }
 0x194   :  { %873 = vmatmul.mubr.msk.f32.vlgmr.msra.gmra.mrb[0].mxu1 %vm46_vm0, %v305_v45 }
 0x195   :  { %875 = vmatprep.mubr.msk.f32.mxu1 %vm46_vm0, %v307_v46 }
 0x198   :  { %876 = vmatmul.mubr.msk.f32.gmra.mrb[2].mxu1 %vm46_vm0, %v309_v47 }
 0x267   :  { %v874_v56 = vpop.f32.mrb[0].mxu1 }
 0x268   :  { %v450_v57 = vadd.f32 %v874_v56, %v295_v52  ;;  %v444_v58 = vpop.f32.mrb[1].mxu1 }
 0x269   :  { %v445_v59 = vadd.f32 %v444_v58, %v294_v53 }
 0x26a   :  { %v467_v60 = vsel %vm463_vm4, %v450_v57, -inf }
 0x26b   :  { %468 = vmax.xlane.f32.xlu1 %v467_v60  ;;  %v877_v63 = vpop.f32.mrb[2].mxu1  ;;  %v464_v0 = vsel %vm463_vm4, %v445_v59, -inf }
 0x26c   :  { %v454_v3 = vpop.f32.mrb[3].mxu1  ;;  %465 = vmax.xlane.f32.xlu0 %v464_v0  ;;  %v460_v9 = vadd.f32 %v877_v63, %v297_v2 }
 0x26d   :  { %v455_v4 = vadd.f32 %v454_v3, %v296_v61 }
 0x26e   :  { %v473_v12 = vsel %vm463_vm4, %v460_v9, -inf }
 0x26f   :  { %v470_v10 = vsel %vm463_vm4, %v455_v4, -inf }
 0x270   :  { %471 = vmax.xlane.f32.xlu0 %v470_v10 }
 0x274   :  { %474 = vmax.xlane.f32.xlu0 %v473_v12 }
 0x27c   :  { %660 = vperm.xlu1 %1011, %v655_v13  }
 0x2f8   :  { %v469_v14 = vpop.xlane.xlu1 %468 }
 0x2f9   :  { %v477_v17 = vsub.f32 %v450_v57, %v469_v14  ;;  %v466_v18 = vpop.xlane.xlu0 %465 }
 0x2fa   :  { %v476_v19 = vsub.f32 %v445_v59, %v466_v18 }
 0x2fb   :  { %v482_v20 = vmul.f32 1.442695, %v477_v17 }
 0x2fc   :  { %v480_v21 = vmul.f32 1.442695, %v476_v19  ;;  %v661_v43 = vpop.permute.xlu1 %660 }
 0x2fd   :  { %1013 = vpow2.f32 %v482_v20  ;;  %v472_v22 = vpop.xlane.xlu0 %471  ;;  %vm671_vm10 = vcmp.eq.s32.totalorder %v661_v43, 1 }
 0x2fe   :  { %1015 = vpow2.f32 %v480_v21  ;;  %v478_v23 = vsub.f32 %v455_v4, %v472_v22 }
 0x300   :  { %v484_v24 = vmul.f32 1.442695, %v478_v23 }
 0x301   :  { %v475_v25 = vpop.xlane.xlu0 %474 }
 0x302   :  { %1017 = vpow2.f32 %v484_v24  ;;  %v479_v26 = vsub.f32 %v460_v9, %v475_v25 }
 0x304   :  { %v486_v27 = vmul.f32 1.442695, %v479_v26 }
 0x306   :  { %1019 = vpow2.f32 %v486_v27 }
 0x307   :  { %v1014_v28 = vpop.eup %1013 }
 0x308   :  { %v1016_v29 = vpop.eup %1015  ;;  %v491_v30 = vsel %vm463_vm4, %v1014_v28, 0.0 }
 0x309   :  { %492 = vadd.xlane.f32.xlu0 %v491_v30  ;;  %902 = vmatprep.mubr.msk.f32.mxu0 %vm463_vm4, %v1016_v29  ;;  %v488_v31 = vsel %vm463_vm4, %v1016_v29, 0.0 }
 0x30a   :  { %903 = vmatmul.mubr.msk.f32.vlgmr.msra.gmra.mrb[16].mxu0 %vm463_vm4, %v1014_v28  ;;  %489 = vadd.xlane.f32.xlu1 %v488_v31 }
 0x30c   :  { %v1018_v33 = vpop.eup %1017 }
 0x30d   :  { %905 = vmatprep.mubr.msk.f32.mxu0 %vm463_vm4, %v1018_v33  ;;  %v494_v41 = vsel %vm463_vm4, %v1018_v33, 0.0 }
 0x310   :  { %v1020_v35 = vpop.eup %1019 }
 0x311   :  { %906 = vmatmul.mubr.msk.f32.gmra.mrb[18].mxu0 %vm463_vm4, %v1020_v35  ;;  %v497_v36 = vsel %vm463_vm4, %v1020_v35, 0.0 }
 0x312   :  { %498 = vadd.xlane.f32.xlu0 %v497_v36 }
 0x31b   :  { %666 = vperm.xlu1 %1011, %v657_v38  }
 0x328   :  { %663 = vperm.xlu0 %1012, %v656_v40  }
 0x33f   :  { %495 = vadd.xlane.f32.xlu1 %v494_v41 }
 0x350   :  { %669 = vperm.xlu1 %1011, %v658_v42  }
 0x396   :  { %v493_v45 = vpop.xlane.xlu0 %492 }
 0x397   :  { %v490_v44 = vpop.xlane.xlu1 %489  ;;  %1021 = vrcp.f32 %v493_v45 }
 0x398   :  { %1023 = vrcp.f32 %v490_v44 }
 0x39b   :  { %v667_v46 = vpop.permute.xlu1 %666 }
 0x39c   :  { %vm673_vm12 = vcmp.eq.s32.totalorder %v667_v46, 1 }
 0x39f   :  { %v499_v47 = vpop.xlane.xlu0 %498 }
 0x3a0   :  { %1025 = vrcp.f32 %v499_v47 }
 0x3a1   :  { %v1022_v50 = vpop.eup %1021 }
 0x3a2   :  { %v1024_v51 = vpop.eup %1023  ;;  %v602_v52 = vmul.f32 %v1022_v50, %v493_v45 }
 0x3a3   :  { %v601_v53 = vmul.f32 %v1024_v51, %v490_v44 }
 0x3a4   :  { %v606_v55 = vsub.f32 2.0, %v602_v52 }
 0x3a5   :  { %v605_v57 = vsub.f32 2.0, %v601_v53 }
 0x3a6   :  { %v610_v60 = vmul.f32 %v1022_v50, %v606_v55 }
 0x3a7   :  { %v664_v48 = vpop.permute.xlu0 %663  ;;  %v609_v62 = vmul.f32 %v1024_v51, %v605_v57 }
 0x3a8   :  { %vm672_vm9 = vcmp.eq.s32.totalorder %v664_v48, 1 }
 0x3aa   :  { %v1026_v54 = vpop.eup %1025 }
 0x3ab   :  { %v604_v58 = vmul.f32 %v1026_v54, %v499_v47 }
 0x3ad   :  { %v608_v1 = vsub.f32 2.0, %v604_v58 }
 0x3af   :  { %v612_v11 = vmul.f32 %v1026_v54, %v608_v1 }
 0x3cc   :  { %v496_v49 = vpop.xlane.xlu1 %495 }
 0x3cd   :  { %1027 = vrcp.f32 %v496_v49 }
 0x3d0   :  { %v670_v10 = vpop.permute.xlu1 %669 }
 0x3d1   :  { %vm674_vm11 = vcmp.eq.s32.totalorder %v670_v10, 1 }
 0x3d7   :  { %v1028_v56 = vpop.eup %1027 }
 0x3d8   :  { %v603_v59 = vmul.f32 %v1028_v56, %v496_v49 }
 0x3da   :  { %v607_v3 = vsub.f32 2.0, %v603_v59 }
 0x3dc   :  { %v611_v13 = vmul.f32 %v1028_v56, %v607_v3 }
 0x3dd   :  { %v904_v61 = vpop.f32.mrb[16].mxu0 }
 0x3de   :  { %v614_v63 = vmul.f32 %v904_v61, %v610_v60  ;;  %v578_v0 = vpop.f32.mrb[17].mxu0 }
 0x3df   :  { %v613_v2 = vmul.f32 %v609_v62, %v578_v0 }
 0x3e0   :  { %v676_v4 = vsel %vm672_vm9, %v614_v63, 0.0 }
 0x3e1   :  { %v675_v5 = vsel %vm671_vm10, %v613_v2, 0.0  ;;  %v680_v8 = vadd.f32 %v676_v4, %v1125_v7 }
 0x3e2   :  { %v679_v9 = vadd.f32 %v675_v5, %v1120_v6 }
 0x3e3   :  { %684 = vst.msk [vmem:[%s1421_s7 + $0x8] sm:$0xff] %vm46_vm0, %v680_v8 }
 0x3e4   :  { %683 = vst.msk [vmem:[%s1421_s7] sm:$0xff] %vm46_vm0, %v679_v9  ;;  %v907_v12 = vpop.f32.mrb[18].mxu0 }
 0x3e5   :  { %v616_v14 = vmul.f32 %v907_v12, %v612_v11  ;;  %v588_v17 = vpop.f32.mrb[19].mxu0 }
 0x3e6   :  { %v615_v7 = vmul.f32 %v611_v13, %v588_v17 }
 0x3e7   :  { %v678_v6 = vsel %vm674_vm11, %v616_v14, 0.0 }
 0x3e8   :  { %v682_v18 = vadd.f32 %v678_v6, %v1181_v16  ;;  %v677_v19 = vsel %vm673_vm12, %v615_v7, 0.0 }
 0x3e9   :  { %v681_v20 = vadd.f32 %v677_v19, %v1176_v15 }
 0x3ea   :  { %686 = vst.msk [vmem:[%s1421_s7 + $0x18] sm:$0xff] %vm46_vm0, %v682_v18 }
 0x3eb   :  { %685 = vst.msk [vmem:[%s1421_s7 + $0x10] sm:$0xff] %vm46_vm0, %v681_v20 }

</bundles_post_ra>
